<compile_context>
chip_gen: v5e
topology: v5e:2x2
jax: 0.10.0
libtpu: 0.0.40
codegen_flags: <defaults>
</compile_context>

<pallas_src>
import jax
import jax.numpy as jnp
from jax.experimental import pallas as pl
from jax.experimental.pallas import tpu as pltpu


def _round_up(x, m):
    return (x + m - 1) // m * m


def _actor_kernel(x_ref, w1_ref, b1_ref, w2_ref, b2_ref, w3_ref, b3_ref, o_ref):
    # linear1 + relu
    x = x_ref[...]
    h1 = jnp.dot(x, w1_ref[...], preferred_element_type=jnp.float32) + b1_ref[...]
    h1 = jnp.maximum(h1, 0.0)
    # linear2 + relu
    h2 = jnp.dot(h1, w2_ref[...], preferred_element_type=jnp.float32) + b2_ref[...]
    h2 = jnp.maximum(h2, 0.0)
    # output_linear + softmax over the (narrow) action axis
    logits = jnp.dot(h2, w3_ref[...], preferred_element_type=jnp.float32) + b3_ref[...]
    m = jnp.max(logits, axis=-1, keepdims=True)
    e = jnp.exp(logits - m)
    denom = jnp.sum(e, axis=-1, keepdims=True)
    o_ref[...] = (e / denom).astype(o_ref.dtype)  # exact divide: rows sum to 1


def discrete_actor_forward(state, params, *, tb_max=4096):
    """state: [B, state_dim] f32 -> probs: [B, action_dim] f32."""
    w1, b1, w2, b2, w3, b3 = params
    B, state_dim = state.shape
    hidden_dim = w1.shape[1]
    h2_dim = w2.shape[1]
    action_dim = w3.shape[1]

    # --- waste-aware batch tile selection ---------------------------------
    # Split the batch into balanced tiles (multiple of 8 sublanes) instead of
    # padding up to a fixed tile; force >=2 grid steps when possible so the
    # "parallel" axis can use both TensorCores on v7x.
    B8 = _round_up(B, 8)
    min_steps = 2 if B8 >= 16 else 1
    n_steps = max(pl.cdiv(B8, tb_max), min_steps)
    tb = _round_up(pl.cdiv(B8, n_steps), 8)
    Bp = _round_up(B, tb)
    xp = jnp.pad(state, ((0, Bp - B), (0, 0))) if Bp != B else state
    grid = (Bp // tb,)

    weight_bytes = 4 * (w1.size + b1.size + w2.size + b2.size + w3.size + b3.size)
    cost = pl.CostEstimate(
        flops=2 * Bp * (state_dim * hidden_dim + hidden_dim * h2_dim + h2_dim * action_dim),
        transcendentals=Bp * action_dim,
        bytes_accessed=4 * Bp * (state_dim + action_dim) + weight_bytes,
    )

    # Explicit VMEM budget (double-buffered streamed tiles + resident weights
    # + headroom), capped at v7x's 64 MiB physical VMEM.
    tile_bytes = 4 * tb * (state_dim + action_dim)
    vmem_limit = int(min(64 << 20, max(32 << 20, 2 * tile_bytes + 2 * weight_bytes + (2 << 20))))

    out = pl.pallas_call(
        _actor_kernel,
        out_shape=jax.ShapeDtypeStruct((Bp, action_dim), jnp.float32),
        grid=grid,
        in_specs=[
            pl.BlockSpec((tb, state_dim), lambda i: (i, 0)),          # state: streamed per tile
            pl.BlockSpec((state_dim, hidden_dim), lambda i: (0, 0)),  # weights: VMEM-resident
            pl.BlockSpec((1, hidden_dim), lambda i: (0, 0)),
            pl.BlockSpec((hidden_dim, h2_dim), lambda i: (0, 0)),
            pl.BlockSpec((1, h2_dim), lambda i: (0, 0)),
            pl.BlockSpec((h2_dim, action_dim), lambda i: (0, 0)),
            pl.BlockSpec((1, action_dim), lambda i: (0, 0)),
        ],
        out_specs=pl.BlockSpec((tb, action_dim), lambda i: (i, 0)),   # narrow, unpadded output
        compiler_params=pltpu.CompilerParams(
            dimension_semantics=("parallel",),  # shard batch tiles across TCs on v7x
            vmem_limit_bytes=vmem_limit,
        ),
        cost_estimate=cost,
    )(xp, w1, b1, w2, b2, w3, b3)

    return out[:B] if Bp != B else out


def init_params(key, state_dim, action_dim, hidden_dim=128):
    """Deterministic init mimicking the PyTorch module's __init__."""
    h2_dim = hidden_dim // 2
    k1, k2, k3, k4, k5, k6 = jax.random.split(key, 6)

    def xavier_uniform(k, fan_in, fan_out):
        limit = jnp.sqrt(6.0 / (fan_in + fan_out))
        return jax.random.uniform(k, (fan_in, fan_out), jnp.float32, -limit, limit)

    # linear1 / linear2: xavier_uniform weights, uniform(-0.003, 0.003) bias
    w1 = xavier_uniform(k1, state_dim, hidden_dim)
    b1 = jax.random.uniform(k2, (1, hidden_dim), jnp.float32, -0.003, 0.003)
    w2 = xavier_uniform(k3, hidden_dim, h2_dim)
    b2 = jax.random.uniform(k4, (1, h2_dim), jnp.float32, -0.003, 0.003)
    # output_linear: PyTorch default (kaiming-uniform-like) bounds 1/sqrt(fan_in)
    bound = 1.0 / jnp.sqrt(jnp.float32(h2_dim))
    w3 = jax.random.uniform(k5, (h2_dim, action_dim), jnp.float32, -bound, bound)
    b3 = jax.random.uniform(k6, (1, action_dim), jnp.float32, -bound, bound)
    return (w1, b1, w2, b2, w3, b3)


def _reference_forward(state, params):
    w1, b1, w2, b2, w3, b3 = params
    h1 = jnp.maximum(state @ w1 + b1, 0.0)
    h2 = jnp.maximum(h1 @ w2 + b2, 0.0)
    return jax.nn.softmax(h2 @ w3 + b3, axis=-1)


if __name__ == "__main__":
    key = jax.random.PRNGKey(0)
    state_dim, action_dim, hidden_dim = 16, 4, 128
    batch = 8

    pkey, xkey = jax.random.split(key)
    params = init_params(pkey, state_dim, action_dim, hidden_dim)
    state = jax.random.normal(xkey, (batch, state_dim), jnp.float32)

    probs = discrete_actor_forward(state, params)
    jax.block_until_ready(probs)

    # sanity: shape, rows sum to 1, matches pure-JAX reference
    assert probs.shape == (batch, action_dim)
    assert jnp.allclose(jnp.sum(probs, axis=1), 1.0, atol=1e-5)
    ref = _reference_forward(state, params)
    assert jnp.allclose(probs, ref, rtol=1e-4, atol=1e-6)
    print("KERNEL_OK")
</pallas_src>

<mosaic_0001>
module attributes {stable_mosaic.version = 11 : i64} {
  func.func @_actor_kernel(%arg0: i32, %arg1: memref<8x16xf32, #tpu.memory_space<vmem>>, %arg2: memref<16x128xf32, #tpu.memory_space<vmem>>, %arg3: memref<1x128xf32, #tpu.memory_space<vmem>>, %arg4: memref<128x64xf32, #tpu.memory_space<vmem>>, %arg5: memref<1x64xf32, #tpu.memory_space<vmem>>, %arg6: memref<64x4xf32, #tpu.memory_space<vmem>>, %arg7: memref<1x4xf32, #tpu.memory_space<vmem>>, %arg8: memref<8x4xf32, #tpu.memory_space<vmem>>) attributes {dimension_semantics = [#tpu.dimension_semantics<parallel>], iteration_bounds = array<i64: 1>, scalar_prefetch = 0 : i64, scratch_operands = 0 : i64, tpu.core_type = #tpu.core_type<tc>, window_params = [{transform_indices = @transform_0, window_bounds = array<i64: 8, 16>}, {pipeline_mode = #tpu.pipeline_mode<synchronous>, transform_indices = @transform_1, window_bounds = array<i64: 16, 128>}, {pipeline_mode = #tpu.pipeline_mode<synchronous>, transform_indices = @transform_2, window_bounds = array<i64: 1, 128>}, {pipeline_mode = #tpu.pipeline_mode<synchronous>, transform_indices = @transform_3, window_bounds = array<i64: 128, 64>}, {pipeline_mode = #tpu.pipeline_mode<synchronous>, transform_indices = @transform_4, window_bounds = array<i64: 1, 64>}, {pipeline_mode = #tpu.pipeline_mode<synchronous>, transform_indices = @transform_5, window_bounds = array<i64: 64, 4>}, {pipeline_mode = #tpu.pipeline_mode<synchronous>, transform_indices = @transform_6, window_bounds = array<i64: 1, 4>}, {transform_indices = @transform_7, window_bounds = array<i64: 8, 4>}]} {
    %c0 = arith.constant 0 : index
    %c0_0 = arith.constant 0 : index
    %0 = vector.load %arg1[%c0, %c0_0] : memref<8x16xf32, #tpu.memory_space<vmem>>, vector<8x16xf32>
    %c0_1 = arith.constant 0 : index
    %c0_2 = arith.constant 0 : index
    %1 = vector.load %arg2[%c0_1, %c0_2] : memref<16x128xf32, #tpu.memory_space<vmem>>, vector<16x128xf32>
    %cst = arith.constant dense<0.000000e+00> : vector<8x128xf32>
    %2 = tpu.matmul %0, %1, %cst {dimension_numbers = #tpu.dot_dimension_numbers<[1], [0], [0], [1], [0, 0, 1, 1], [], []>} : vector<8x16xf32>, vector<16x128xf32>, vector<8x128xf32> -> vector<8x128xf32>
    %c0_3 = arith.constant 0 : index
    %c0_4 = arith.constant 0 : index
    %3 = vector.load %arg3[%c0_3, %c0_4] : memref<1x128xf32, #tpu.memory_space<vmem>>, vector<1x128xf32>
    %4 = vector.broadcast %3 : vector<1x128xf32> to vector<8x128xf32>
    %5 = arith.addf %2, %4 : vector<8x128xf32>
    %cst_5 = arith.constant 0.000000e+00 : f32
    %6 = vector.broadcast %cst_5 : f32 to vector<8x128xf32>
    %7 = arith.maximumf %5, %6 : vector<8x128xf32>
    %c0_6 = arith.constant 0 : index
    %c0_7 = arith.constant 0 : index
    %8 = vector.load %arg4[%c0_6, %c0_7] : memref<128x64xf32, #tpu.memory_space<vmem>>, vector<128x64xf32>
    %cst_8 = arith.constant dense<0.000000e+00> : vector<8x64xf32>
    %9 = tpu.matmul %7, %8, %cst_8 {dimension_numbers = #tpu.dot_dimension_numbers<[1], [0], [0], [1], [0, 0, 1, 1], [], []>} : vector<8x128xf32>, vector<128x64xf32>, vector<8x64xf32> -> vector<8x64xf32>
    %c0_9 = arith.constant 0 : index
    %c0_10 = arith.constant 0 : index
    %10 = vector.load %arg5[%c0_9, %c0_10] : memref<1x64xf32, #tpu.memory_space<vmem>>, vector<1x64xf32>
    %11 = vector.broadcast %10 : vector<1x64xf32> to vector<8x64xf32>
    %12 = arith.addf %9, %11 : vector<8x64xf32>
    %cst_11 = arith.constant 0.000000e+00 : f32
    %13 = vector.broadcast %cst_11 : f32 to vector<8x64xf32>
    %14 = arith.maximumf %12, %13 : vector<8x64xf32>
    %c0_12 = arith.constant 0 : index
    %c0_13 = arith.constant 0 : index
    %15 = vector.load %arg6[%c0_12, %c0_13] : memref<64x4xf32, #tpu.memory_space<vmem>>, vector<64x4xf32>
    %cst_14 = arith.constant dense<0.000000e+00> : vector<8x4xf32>
    %16 = tpu.matmul %14, %15, %cst_14 {dimension_numbers = #tpu.dot_dimension_numbers<[1], [0], [0], [1], [0, 0, 1, 1], [], []>} : vector<8x64xf32>, vector<64x4xf32>, vector<8x4xf32> -> vector<8x4xf32>
    %c0_15 = arith.constant 0 : index
    %c0_16 = arith.constant 0 : index
    %17 = vector.load %arg7[%c0_15, %c0_16] : memref<1x4xf32, #tpu.memory_space<vmem>>, vector<1x4xf32>
    %18 = vector.broadcast %17 : vector<1x4xf32> to vector<8x4xf32>
    %19 = arith.addf %16, %18 : vector<8x4xf32>
    %cst_17 = arith.constant dense<0xFF800000> : vector<8xf32>
    %20 = vector.multi_reduction <maximumf>, %19, %cst_17 [1] : vector<8x4xf32> to vector<8xf32>
    %21 = vector.shape_cast %20 : vector<8xf32> to vector<8x1xf32>
    %22 = vector.broadcast %21 : vector<8x1xf32> to vector<8x4xf32>
    %23 = arith.subf %19, %22 : vector<8x4xf32>
    %24 = math.exp %23 : vector<8x4xf32>
    %cst_18 = arith.constant dense<0.000000e+00> : vector<8xf32>
    %25 = vector.multi_reduction <add>, %24, %cst_18 [1] : vector<8x4xf32> to vector<8xf32>
    %26 = vector.shape_cast %25 : vector<8xf32> to vector<8x1xf32>
    %27 = vector.broadcast %26 : vector<8x1xf32> to vector<8x4xf32>
    %28 = arith.divf %24, %27 : vector<8x4xf32>
    %c0_19 = arith.constant 0 : index
    %c0_20 = arith.constant 0 : index
    %29 = vector.load %arg8[%c0_19, %c0_20] : memref<8x4xf32, #tpu.memory_space<vmem>>, vector<8x4xf32>
    tpu.vector_store %arg8[%c0_19, %c0_20], %28 {strides = array<i32>} : memref<8x4xf32, #tpu.memory_space<vmem>>, vector<8x4xf32>,
    return
  }
  func.func @transform_0(%arg0: i32) -> (i32, i32) {
    %c0_i32 = arith.constant 0 : i32
    %c0_i32_0 = arith.constant 0 : i32
    return %arg0, %c0_i32 : i32, i32
  }
  func.func @transform_1(%arg0: i32) -> (i32, i32) {
    %c0_i32 = arith.constant 0 : i32
    %c0_i32_0 = arith.constant 0 : i32
    %c0_i32_1 = arith.constant 0 : i32
    return %c0_i32, %c0_i32_0 : i32, i32
  }
  func.func @transform_2(%arg0: i32) -> (i32, i32) {
    %c0_i32 = arith.constant 0 : i32
    %c0_i32_0 = arith.constant 0 : i32
    %c0_i32_1 = arith.constant 0 : i32
    return %c0_i32, %c0_i32_0 : i32, i32
  }
  func.func @transform_3(%arg0: i32) -> (i32, i32) {
    %c0_i32 = arith.constant 0 : i32
    %c0_i32_0 = arith.constant 0 : i32
    %c0_i32_1 = arith.constant 0 : i32
    return %c0_i32, %c0_i32_0 : i32, i32
  }
  func.func @transform_4(%arg0: i32) -> (i32, i32) {
    %c0_i32 = arith.constant 0 : i32
    %c0_i32_0 = arith.constant 0 : i32
    %c0_i32_1 = arith.constant 0 : i32
    return %c0_i32, %c0_i32_0 : i32, i32
  }
  func.func @transform_5(%arg0: i32) -> (i32, i32) {
    %c0_i32 = arith.constant 0 : i32
    %c0_i32_0 = arith.constant 0 : i32
    %c0_i32_1 = arith.constant 0 : i32
    return %c0_i32, %c0_i32_0 : i32, i32
  }
  func.func @transform_6(%arg0: i32) -> (i32, i32) {
    %c0_i32 = arith.constant 0 : i32
    %c0_i32_0 = arith.constant 0 : i32
    %c0_i32_1 = arith.constant 0 : i32
    return %c0_i32, %c0_i32_0 : i32, i32
  }
  func.func @transform_7(%arg0: i32) -> (i32, i32) {
    %c0_i32 = arith.constant 0 : i32
    %c0_i32_0 = arith.constant 0 : i32
    return %arg0, %c0_i32 : i32, i32
  }
}

</mosaic_0001>

<bundles_post_ra>
// kernel: tpu_custom_call.1
= control target key start
LH: loop header
LB: loop body
LE: loop exit
PB: predicated region body
PF: predicated region fallthrough
CT: control target
= control target key end

     0   :  { %vm33_vm0 = vcmask 130048   ;;  %vm111_vm1 = vcmask 523264   ;;  %vm135_vm2 = vcmask 31744   ;;  %s310_s1 = inlined_call_operand.vmem [shape: f32[16,128], index: 1, kind: input, shape index: {}]   ;;  %s311_s0 = inlined_call_operand.vmem [shape: f32[8,16], index: 0, kind: input, shape index: {}]   ;;  %s312_s3 = inlined_call_operand.vmem [shape: f32[128,64], index: 3, kind: input, shape index: {}]   ;;  %s313_s2 = inlined_call_operand.vmem [shape: f32[1,128], index: 2, kind: input, shape index: {}]   ;;  %s314_s4 = inlined_call_operand.vmem [shape: f32[1,64], index: 4, kind: input, shape index: {}]   ;;  %s315_s5 = inlined_call_operand.vmem [shape: f32[64,4], index: 5, kind: input, shape index: {}]   ;;  %s316_s6 = inlined_call_operand.vmem [shape: f32[1,4], index: 6, kind: input, shape index: {}]   ;;  %s317_s7 = inlined_call_operand.vmem [shape: f32[8,4], index: 7, kind: output, shape index: {}]  }
   0x1   :  { %v28_v0 = vld [vmem:[%s310_s1 + $0x8] sm:$0xff]  ;;  %v27_v1 = vld [vmem:[%s310_s1] sm:$0xff]  ;;  %v73_v3 = vld [vmem:[%s312_s3 + $0x78] sm:$0xff] }
   0x2   :  { %51 = vmatpush.msra.mxu0 %v28_v0  ;;  %v26_v2 = vld [vmem:[%s311_s0] sm:$0xff]  ;;  %v72_v4 = vld [vmem:[%s312_s3 + $0x70] sm:$0xff]  ;;  %78 = vmatpush.msra.mxu1 %v73_v3  ;;  %v71_v5 = vld [vmem:[%s312_s3 + $0x68] sm:$0xff] }
   0x3   :  { %v70_v6 = vld [vmem:[%s312_s3 + $0x60] sm:$0xff]  ;;  %v69_v7 = vld [vmem:[%s312_s3 + $0x58] sm:$0xff]  ;;  %v68_v8 = vld [vmem:[%s312_s3 + $0x50] sm:$0xff] }
   0x4   :  { %52 = vmatpush.msra.mxu0 %v27_v1  ;;  %79 = vmatpush.msra.mxu1 %v72_v4  ;;  %v67_v9 = vld [vmem:[%s312_s3 + $0x48] sm:$0xff]  ;;  %v66_v10 = vld [vmem:[%s312_s3 + $0x40] sm:$0xff]  ;;  %v65_v11 = vld [vmem:[%s312_s3 + $0x38] sm:$0xff] }
   0x5   :  { %165 = vmatmul.msk.f32.vlgmr.msra.gmra.mxu0 %vm33_vm0, %v26_v2  ;;  %v64_v12 = vld [vmem:[%s312_s3 + $0x30] sm:$0xff]  ;;  %v63_v13 = vld [vmem:[%s312_s3 + $0x28] sm:$0xff]  ;;  %v62_v14 = vld [vmem:[%s312_s3 + $0x20] sm:$0xff] }
   0x6   :  { %80 = vmatpush.msra.mxu1 %v71_v5  ;;  %v61_v15 = vld [vmem:[%s312_s3 + $0x18] sm:$0xff]  ;;  %v60_v16 = vld [vmem:[%s312_s3 + $0x10] sm:$0xff]  ;;  %v59_v17 = vld [vmem:[%s312_s3 + $0x8] sm:$0xff] }
   0x7   :  { %v58_v18 = vld [vmem:[%s312_s3] sm:$0xff]  ;;  %v106_v19 = vld [vmem:[%s315_s5 + $0x38] sm:$0xff]  ;;  %v105_v20 = vld [vmem:[%s315_s5 + $0x30] sm:$0xff] }
   0x8   :  { %81 = vmatpush.msra.mxu1 %v70_v6  ;;  %123 = vmatpush.msra.mxu2 %v106_v19  ;;  %v104_v21 = vld [vmem:[%s315_s5 + $0x28] sm:$0xff]  ;;  %v103_v22 = vld [vmem:[%s315_s5 + $0x20] sm:$0xff]  ;;  %v102_v23 = vld [vmem:[%s315_s5 + $0x18] sm:$0xff] }
   0x9   :  { %v167_v24 = vld [vmem:[%s313_s2] ss:$0 sm:$0xff]  ;;  %v101_v28 = vld [vmem:[%s315_s5 + $0x10] sm:$0xff]  ;;  %v100_v29 = vld [vmem:[%s315_s5 + $0x8] sm:$0xff] }
   0xa   :  { %82 = vmatpush.msra.mxu1 %v69_v7  ;;  %124 = vmatpush.msra.mxu2 %v105_v20  ;;  %v99_v30 = vld [vmem:[%s315_s5] sm:$0xff] }
   0xb   :  { %v168_v31 = vld [vmem:[%s314_s4] ss:$0 sm:$0xff] }
   0xc   :  { %83 = vmatpush.msra.mxu1 %v68_v8  ;;  %125 = vmatpush.msra.mxu2 %v104_v21  ;;  %v169_v35 = vld [vmem:[%s316_s6] ss:$0 sm:$0xff] }
   0xe   :  { %84 = vmatpush.msra.mxu1 %v67_v9  ;;  %126 = vmatpush.msra.mxu2 %v103_v22 }
  0x10   :  { %85 = vmatpush.msra.mxu1 %v66_v10  ;;  %127 = vmatpush.msra.mxu2 %v102_v23 }
  0x12   :  { %86 = vmatpush.msra.mxu1 %v65_v11  ;;  %128 = vmatpush.msra.mxu2 %v101_v28 }
  0x14   :  { %87 = vmatpush.msra.mxu1 %v64_v12  ;;  %129 = vmatpush.msra.mxu2 %v100_v29 }
  0x16   :  { %88 = vmatpush.msra.mxu1 %v63_v13  ;;  %130 = vmatpush.msra.mxu2 %v99_v30 }
  0x18   :  { %89 = vmatpush.msra.mxu1 %v62_v14 }
  0x1a   :  { %90 = vmatpush.msra.mxu1 %v61_v15 }
  0x1c   :  { %91 = vmatpush.msra.mxu1 %v60_v16 }
  0x1e   :  { %92 = vmatpush.msra.mxu1 %v59_v17 }
  0x20   :  { %93 = vmatpush.msra.mxu1 %v58_v18 }
  0x82   :  { %v54_v25 = vpop.f32.mrf.mxu0 }
  0x83   :  { %v55_v26 = vadd.f32 %v167_v24, %v54_v25 }
  0x85   :  { %v57_v27 = vmax.f32 %v55_v26, 0.0 }
  0x87   :  { %94 = vmatmul.f32.vlgmr.msra.gmra.mxu1 %v57_v27 }
 0x104   :  { %v95_v32 = vpop.f32.mrf.mxu1 }
 0x105   :  { %v96_v33 = vadd.f32 %v168_v31, %v95_v32 }
 0x107   :  { %v98_v34 = vmax.f32 %v96_v33, 0.0 }
 0x109   :  { %166 = vmatmul.msk.f32.vlgmr.msra.gmra.mxu2 %vm111_vm1, %v98_v34 }
 0x18c   :  { %v132_v36 = vpop.f32.mrf.mxu2 }
 0x18d   :  { %v133_v37 = vadd.f32 %v169_v35, %v132_v36 }
 0x18f   :  { %v136_v38 = vsel %vm135_vm2, %v133_v37, -inf }
 0x190   :  { %137 = vmax.xlane.f32.xlu0 %v136_v38 }
 0x203   :  { %v138_v39 = vpop.xlane.xlu0 %137 }
 0x204   :  { %v139_v40 = vsub.f32 %v133_v37, %v138_v39 }
 0x206   :  { %v140_v41 = vmul.f32 1.442695, %v139_v40 }
 0x208   :  { %170 = vpow2.f32 %v140_v41 }
 0x20e   :  { %v171_v42 = vpop.eup %170 }
 0x20f   :  { %v142_v43 = vsel %vm135_vm2, %v171_v42, 0.0 }
 0x210   :  { %143 = vadd.xlane.f32.xlu0 %v142_v43 }
 0x283   :  { %v144_v44 = vpop.xlane.xlu0 %143 }
 0x284   :  { %172 = vrcp.f32 %v144_v44  ;;  %v156_v48 = vand.u32 2147483648, %v144_v44  ;;  %v154_v50 = vand.u32 2147483647, %v144_v44  ;;  %vm150_vm4 = vweird.f32 %v144_v44 }
 0x286   :  { %v157_v52 = vor.u32 1.1754944e-38, %v156_v48  ;;  %vm155_vm6 = vcmp.eq.f32.partialorder %v154_v50, 8.507059e+37 }
 0x28a   :  { %v173_v45 = vpop.eup %172 }
 0x28b   :  { %v146_v46 = vmul.f32 %v173_v45, %v144_v44  ;;  %vm151_vm3 = vweird.f32 %v173_v45 }
 0x28c   :  { %vm152_vm5 = vmor %vm150_vm4, %vm151_vm3 }
 0x28d   :  { %v147_v47 = vsub.f32 1.0, %v146_v46 }
 0x28f   :  { %v148_v49 = vmul.f32 %v173_v45, %v147_v47 }
 0x291   :  { %v149_v51 = vadd.f32 %v173_v45, %v148_v49 }
 0x293   :  { %v153_v53 = vsel %vm152_vm5, %v173_v45, %v149_v51 }
 0x294   :  { %v158_v54 = vsel %vm155_vm6, %v157_v52, %v153_v53 }
 0x295   :  { %v159_v55 = vmul.f32 %v171_v42, %v158_v54 }
 0x297   :  { %160 = vst.msk [vmem:[%s317_s7] sm:$0xff] %vm135_vm2, %v159_v55 }

</bundles_post_ra>
